<compile_context>
chip_gen: v5e
topology: v5e:2x2
jax: 0.10.0
libtpu: 0.0.40
codegen_flags: <defaults>
</compile_context>

<pallas_src>
import jax
import jax.numpy as jnp
from jax import lax
from jax.experimental import pallas as pl
from jax.experimental.pallas import tpu as pltpu

LN_EPS = 1e-5


def sgu_kernel(u_ref, v_ref, gamma_ref, beta_ref, w_ref, b_ref, o_ref):
    # u_ref, v_ref, o_ref: (bb, L, D) model dtype
    # gamma_ref, beta_ref: (1, D) f32;  w_ref: (L, L) mm dtype;  b_ref: (L, 1) f32
    bb, L, D = u_ref.shape
    inv_d = jnp.float32(1.0 / D)

    # Hoisted loop-invariants (JAX does not CSE broadcast_in_dim).
    w = w_ref[...]                                      # (L, L), stays in VMEM/vregs
    gamma = gamma_ref[...]                              # (1, D) f32
    beta = beta_ref[...]                                # (1, D) f32
    bias_ld = jnp.broadcast_to(b_ref[...], (L, D))      # (L, 1) -> (L, D), once per step

    def body(bi, carry):
        # Per-batch-element temporaries only: O(L*D) f32 live at any time.
        v = v_ref[bi].astype(jnp.float32)               # (L, D)
        # One-pass LN statistics (f32): mean and E[v^2]; reductions run on the XLU.
        mean = jnp.sum(v, axis=-1, keepdims=True) * inv_d
        ex2 = jnp.sum(v * v, axis=-1, keepdims=True) * inv_d
        var = ex2 - mean * mean
        # Fold rsqrt and the affine scale into one multiplier.
        v_norm = (v - mean) * (lax.rsqrt(var + LN_EPS) * gamma) + beta
        # Spatial projection on the MXU: (L, L) @ (L, D), f32 accumulation.
        sp = jnp.dot(w, v_norm.astype(w.dtype),
                     preferred_element_type=jnp.float32) + bias_ld
        o_ref[bi] = (u_ref[bi].astype(jnp.float32) * sp).astype(o_ref.dtype)
        return carry

    lax.fori_loop(0, bb, body, 0, unroll=bool(bb <= 8))


def spatial_gating_unit(x, gamma, beta, w, b):
    """x: (B, L, 2*D) -> (B, L, D)."""
    B, L, two_d = x.shape
    D = two_d // 2
    assert two_d == 2 * D

    # LN params / spatial bias stay f32 (tiny, used in f32 math); the spatial weight
    # follows the model dtype so the MXU runs narrow when the model is bf16.
    mm_dtype = jnp.bfloat16 if x.dtype == jnp.bfloat16 else jnp.float32
    gamma2 = gamma.reshape(1, D).astype(jnp.float32)
    beta2 = beta.reshape(1, D).astype(jnp.float32)
    w2 = w.reshape(L, L).astype(mm_dtype)
    b2 = b.reshape(L, 1).astype(jnp.float32)

    itemsize = jnp.dtype(x.dtype).itemsize
    w_itemsize = jnp.dtype(mm_dtype).itemsize

    # Generation-aware VMEM ceiling: 3/4 of physical per-core VMEM, capped at 64 MiB
    # (-> ~48 MiB on v7x's 64 MiB cores, 64 MiB on v5e/v6e's 128 MiB cores).
    try:
        vmem_cap = int(pltpu.get_tpu_info().vmem_capacity_bytes)
    except Exception:
        vmem_cap = 64 * 1024 * 1024
    vmem_limit = int(min(vmem_cap * 3 // 4, 64 * 1024 * 1024))

    # Batch-block selection: per-step VMEM = double-buffered u/v/out tiles + params +
    # O(L*D) f32 per-batch temporaries (independent of bb thanks to the in-kernel loop).
    headroom = 4 * 1024 * 1024
    fixed = (2 * L * L * w_itemsize          # W (double-buffered)
             + 4 * 2 * D * 4                 # gamma/beta (double-buffered)
             + 2 * L * 4                     # bias (double-buffered)
             + 5 * L * D * 4)                # per-batch f32 temporaries + bias broadcast
    per_batch_io = 3 * L * D * itemsize * 2  # u, v, out tiles, double-buffered
    budget = max(vmem_limit - headroom - fixed, per_batch_io)
    bb = max(1, min(B, budget // per_batch_io))

    # Keep >= 4 grid steps (so DMA-in / compute / DMA-out actually pipeline) and >= 2
    # steps for v7x megacore, whenever the batch size allows.
    if B >= 4:
        bb = min(bb, B // 4)
    elif B >= 2:
        bb = min(bb, B // 2)
    bb = max(1, bb)
    while B % bb:
        bb -= 1

    if D % 128 == 0:
        # Zero-copy split: pass x twice; lane-block index 0 -> u half, 1 -> v half.
        u_in, v_in = x, x
        u_spec = pl.BlockSpec((bb, L, D), lambda i: (i, 0, 0))
        v_spec = pl.BlockSpec((bb, L, D), lambda i: (i, 0, 1))
        x_read_bytes = B * L * 2 * D * itemsize
    else:
        # Lane-unaligned split would force an in-kernel relayout; split once in XLA.
        u_in = lax.slice_in_dim(x, 0, D, axis=2)
        v_in = lax.slice_in_dim(x, D, 2 * D, axis=2)
        u_spec = pl.BlockSpec((bb, L, D), lambda i: (i, 0, 0))
        v_spec = pl.BlockSpec((bb, L, D), lambda i: (i, 0, 0))
        x_read_bytes = 2 * B * L * D * itemsize

    cost = pl.CostEstimate(
        flops=2 * B * L * L * D + 10 * B * L * D,
        transcendentals=0,
        bytes_accessed=(x_read_bytes
                        + B * L * D * itemsize            # out write
                        + L * L * w_itemsize              # W
                        + (2 * D + L) * 4),               # gamma, beta, bias
    )

    return pl.pallas_call(
        sgu_kernel,
        out_shape=jax.ShapeDtypeStruct((B, L, D), x.dtype),
        grid_spec=pltpu.PrefetchScalarGridSpec(
            num_scalar_prefetch=0,
            grid=(B // bb,),
            in_specs=[
                u_spec,                                   # u half of x
                v_spec,                                   # v half of x
                pl.BlockSpec((1, D), lambda i: (0, 0)),   # LN gamma
                pl.BlockSpec((1, D), lambda i: (0, 0)),   # LN beta
                pl.BlockSpec((L, L), lambda i: (0, 0)),   # spatial_proj weight
                pl.BlockSpec((L, 1), lambda i: (0, 0)),   # spatial_proj bias
            ],
            out_specs=pl.BlockSpec((bb, L, D), lambda i: (i, 0, 0)),
        ),
        compiler_params=pltpu.CompilerParams(
            dimension_semantics=("parallel",),
            vmem_limit_bytes=vmem_limit,
        ),
        cost_estimate=cost,
    )(u_in, v_in, gamma2, beta2, w2, b2)


def reference(x, gamma, beta, w, b):
    B, L, two_d = x.shape
    D = two_d // 2
    u, v = x[..., :D], x[..., D:]
    mean = jnp.mean(v, axis=-1, keepdims=True)
    var = jnp.mean((v - mean) ** 2, axis=-1, keepdims=True)
    vn = (v - mean) / jnp.sqrt(var + LN_EPS) * gamma + beta
    sp = jnp.einsum("ij,bjd->bid", w, vn,
                    precision=jax.lax.Precision.HIGHEST) + b[None, :, None]
    return u * sp


if __name__ == "__main__":
    # batch, seq_len, d_ffn  ->  x: (B, L, 2*D).  D is a lane multiple so the
    # zero-copy BlockSpec split path is exercised; B=4 gives a 4-step pipelined grid.
    B, L, D = 4, 8, 128
    key = jax.random.PRNGKey(0)
    kx, kw, kg, kb = jax.random.split(key, 4)

    x = jax.random.normal(kx, (B, L, 2 * D), dtype=jnp.float32)

    # Parameters (shapes match the PyTorch module; small perturbations exercise affine).
    gamma = 1.0 + 0.05 * jax.random.normal(kg, (D,), dtype=jnp.float32)  # LayerNorm weight
    beta = 0.05 * jax.random.normal(kb, (D,), dtype=jnp.float32)         # LayerNorm bias
    w = jax.random.normal(kw, (L, L), dtype=jnp.float32) * 0.1           # Conv1d(L,L,k=1) weight
    b = jnp.ones((L,), jnp.float32)                                      # nn.init.constant_(bias, 1.0)

    out = jax.block_until_ready(spatial_gating_unit(x, gamma, beta, w, b))

    ref = reference(x, gamma, beta, w, b)
    assert out.shape == (B, L, D)
    # Tolerance accounts for MXU f32 multi-pass matmul + one-pass LN statistics.
    assert jnp.allclose(out, ref, atol=2e-3, rtol=2e-3), "mismatch vs reference"

    print("KERNEL_OK")
</pallas_src>

<mosaic_0001>
module attributes {stable_mosaic.version = 11 : i64} {
  func.func @sgu_kernel(%arg0: i32, %arg1: memref<1x8x128xf32, #tpu.memory_space<vmem>>, %arg2: memref<1x8x128xf32, #tpu.memory_space<vmem>>, %arg3: memref<1x128xf32, #tpu.memory_space<vmem>>, %arg4: memref<1x128xf32, #tpu.memory_space<vmem>>, %arg5: memref<8x8xf32, #tpu.memory_space<vmem>>, %arg6: memref<8x1xf32, #tpu.memory_space<vmem>>, %arg7: memref<1x8x128xf32, #tpu.memory_space<vmem>>) attributes {dimension_semantics = [#tpu.dimension_semantics<parallel>], iteration_bounds = array<i64: 4>, scalar_prefetch = 0 : i64, scratch_operands = 0 : i64, tpu.core_type = #tpu.core_type<tc>, window_params = [{transform_indices = @transform_0, window_bounds = array<i64: 1, 8, 128>}, {transform_indices = @transform_1, window_bounds = array<i64: 1, 8, 128>}, {pipeline_mode = #tpu.pipeline_mode<synchronous>, transform_indices = @transform_2, window_bounds = array<i64: 1, 128>}, {pipeline_mode = #tpu.pipeline_mode<synchronous>, transform_indices = @transform_3, window_bounds = array<i64: 1, 128>}, {pipeline_mode = #tpu.pipeline_mode<synchronous>, transform_indices = @transform_4, window_bounds = array<i64: 8, 8>}, {pipeline_mode = #tpu.pipeline_mode<synchronous>, transform_indices = @transform_5, window_bounds = array<i64: 8, 1>}, {transform_indices = @transform_6, window_bounds = array<i64: 1, 8, 128>}]} {
    %c0 = arith.constant 0 : index
    %c0_0 = arith.constant 0 : index
    %0 = vector.load %arg5[%c0, %c0_0] : memref<8x8xf32, #tpu.memory_space<vmem>>, vector<8x8xf32>
    %c0_1 = arith.constant 0 : index
    %c0_2 = arith.constant 0 : index
    %1 = vector.load %arg3[%c0_1, %c0_2] : memref<1x128xf32, #tpu.memory_space<vmem>>, vector<1x128xf32>
    %c0_3 = arith.constant 0 : index
    %c0_4 = arith.constant 0 : index
    %2 = vector.load %arg4[%c0_3, %c0_4] : memref<1x128xf32, #tpu.memory_space<vmem>>, vector<1x128xf32>
    %c0_5 = arith.constant 0 : index
    %c0_6 = arith.constant 0 : index
    %3 = vector.load %arg6[%c0_5, %c0_6] : memref<8x1xf32, #tpu.memory_space<vmem>>, vector<8x1xf32>
    %4 = vector.shape_cast %3 : vector<8x1xf32> to vector<8x1xf32>
    %5 = vector.broadcast %4 : vector<8x1xf32> to vector<8x128xf32>
    %cst = arith.constant 7.812500e-03 : f32
    %c0_i32 = arith.constant 0 : i32
    %6 = arith.index_cast %c0_i32 : i32 to index
    %c0_7 = arith.constant 0 : index
    %c0_8 = arith.constant 0 : index
    %7 = vector.load %arg2[%6, %c0_7, %c0_8] : memref<1x8x128xf32, #tpu.memory_space<vmem>>, vector<1x8x128xf32>
    %8 = vector.shape_cast %7 : vector<1x8x128xf32> to vector<8x128xf32>
    %cst_9 = arith.constant dense<0.000000e+00> : vector<8xf32>
    %9 = vector.multi_reduction <add>, %8, %cst_9 [1] : vector<8x128xf32> to vector<8xf32>
    %10 = vector.shape_cast %9 : vector<8xf32> to vector<8x1xf32>
    %11 = vector.broadcast %cst : f32 to vector<8x1xf32>
    %12 = arith.mulf %10, %11 : vector<8x1xf32>
    %13 = arith.mulf %8, %8 : vector<8x128xf32>
    %cst_10 = arith.constant dense<0.000000e+00> : vector<8xf32>
    %14 = vector.multi_reduction <add>, %13, %cst_10 [1] : vector<8x128xf32> to vector<8xf32>
    %15 = vector.shape_cast %14 : vector<8xf32> to vector<8x1xf32>
    %16 = vector.broadcast %cst : f32 to vector<8x1xf32>
    %17 = arith.mulf %15, %16 : vector<8x1xf32>
    %18 = arith.mulf %12, %12 : vector<8x1xf32>
    %19 = arith.subf %17, %18 : vector<8x1xf32>
    %20 = vector.broadcast %12 : vector<8x1xf32> to vector<8x128xf32>
    %21 = arith.subf %8, %20 : vector<8x128xf32>
    %cst_11 = arith.constant 9.99999974E-6 : f32
    %22 = vector.broadcast %cst_11 : f32 to vector<8x1xf32>
    %23 = arith.addf %19, %22 : vector<8x1xf32>
    %24 = math.rsqrt %23 : vector<8x1xf32>
    %25 = vector.broadcast %24 : vector<8x1xf32> to vector<8x128xf32>
    %26 = vector.broadcast %1 : vector<1x128xf32> to vector<8x128xf32>
    %27 = arith.mulf %25, %26 : vector<8x128xf32>
    %28 = arith.mulf %21, %27 : vector<8x128xf32>
    %29 = vector.broadcast %2 : vector<1x128xf32> to vector<8x128xf32>
    %30 = arith.addf %28, %29 : vector<8x128xf32>
    %cst_12 = arith.constant dense<0.000000e+00> : vector<8x128xf32>
    %31 = tpu.matmul %0, %30, %cst_12 {dimension_numbers = #tpu.dot_dimension_numbers<[1], [0], [0], [1], [0, 0, 1, 1], [], []>} : vector<8x8xf32>, vector<8x128xf32>, vector<8x128xf32> -> vector<8x128xf32>
    %32 = arith.addf %31, %5 : vector<8x128xf32>
    %33 = arith.index_cast %c0_i32 : i32 to index
    %c0_13 = arith.constant 0 : index
    %c0_14 = arith.constant 0 : index
    %34 = vector.load %arg1[%33, %c0_13, %c0_14] : memref<1x8x128xf32, #tpu.memory_space<vmem>>, vector<1x8x128xf32>
    %35 = vector.shape_cast %34 : vector<1x8x128xf32> to vector<8x128xf32>
    %36 = arith.mulf %35, %32 : vector<8x128xf32>
    %37 = arith.index_cast %c0_i32 : i32 to index
    %c0_15 = arith.constant 0 : index
    %c0_16 = arith.constant 0 : index
    %38 = vector.load %arg7[%37, %c0_15, %c0_16] : memref<1x8x128xf32, #tpu.memory_space<vmem>>, vector<1x8x128xf32>
    %39 = vector.shape_cast %38 : vector<1x8x128xf32> to vector<8x128xf32>
    %40 = vector.shape_cast %36 : vector<8x128xf32> to vector<1x8x128xf32>
    tpu.vector_store %arg7[%37, %c0_15, %c0_16], %40 {strides = array<i32>} : memref<1x8x128xf32, #tpu.memory_space<vmem>>, vector<1x8x128xf32>,
    %c1_i32 = arith.constant 1 : i32
    return
  }
  func.func @transform_0(%arg0: i32) -> (i32, i32, i32) {
    %c0_i32 = arith.constant 0 : i32
    %c0_i32_0 = arith.constant 0 : i32
    %c0_i32_1 = arith.constant 0 : i32
    return %arg0, %c0_i32, %c0_i32_0 : i32, i32, i32
  }
  func.func @transform_1(%arg0: i32) -> (i32, i32, i32) {
    %c0_i32 = arith.constant 0 : i32
    %c1_i32 = arith.constant 1 : i32
    %c0_i32_0 = arith.constant 0 : i32
    return %arg0, %c0_i32, %c1_i32 : i32, i32, i32
  }
  func.func @transform_2(%arg0: i32) -> (i32, i32) {
    %c0_i32 = arith.constant 0 : i32
    %c0_i32_0 = arith.constant 0 : i32
    %c0_i32_1 = arith.constant 0 : i32
    return %c0_i32, %c0_i32_0 : i32, i32
  }
  func.func @transform_3(%arg0: i32) -> (i32, i32) {
    %c0_i32 = arith.constant 0 : i32
    %c0_i32_0 = arith.constant 0 : i32
    %c0_i32_1 = arith.constant 0 : i32
    return %c0_i32, %c0_i32_0 : i32, i32
  }
  func.func @transform_4(%arg0: i32) -> (i32, i32) {
    %c0_i32 = arith.constant 0 : i32
    %c0_i32_0 = arith.constant 0 : i32
    %c0_i32_1 = arith.constant 0 : i32
    return %c0_i32, %c0_i32_0 : i32, i32
  }
  func.func @transform_5(%arg0: i32) -> (i32, i32) {
    %c0_i32 = arith.constant 0 : i32
    %c0_i32_0 = arith.constant 0 : i32
    %c0_i32_1 = arith.constant 0 : i32
    return %c0_i32, %c0_i32_0 : i32, i32
  }
  func.func @transform_6(%arg0: i32) -> (i32, i32, i32) {
    %c0_i32 = arith.constant 0 : i32
    %c0_i32_0 = arith.constant 0 : i32
    %c0_i32_1 = arith.constant 0 : i32
    return %arg0, %c0_i32, %c0_i32_0 : i32, i32, i32
  }
}

</mosaic_0001>

<bundles_post_ra>
// kernel: tpu_custom_call.1
= control target key start
LH: loop header
LB: loop body
LE: loop exit
PB: predicated region body
PF: predicated region fallthrough
CT: control target
= control target key end

     0   :  { %s912_s0 = inlined_call_operand.hbm [shape: f32[4,8,256], index: 0, kind: input, shape index: {}]   ;;  %s913_s1 = inlined_call_operand.hbm [shape: f32[4,8,256], index: 1, kind: input, shape index: {}]   ;;  %s914_s2 = inlined_call_operand.vmem [shape: f32[1,128], index: 2, kind: input, shape index: {}]   ;;  %s915_s3 = inlined_call_operand.vmem [shape: f32[1,128], index: 3, kind: input, shape index: {}]   ;;  %s916_s4 = inlined_call_operand.vmem [shape: f32[8,8], index: 4, kind: input, shape index: {}]   ;;  %s917_s5 = inlined_call_operand.vmem [shape: f32[8,1], index: 5, kind: input, shape index: {}]   ;;  %s918_s6 = inlined_call_operand.hbm [shape: f32[4,8,128], index: 6, kind: output, shape index: {}]  }
   0x1   :  { %920 = sst [smem:[#allocation13_spill]] %s912_s0 }
   0x2   :  { %11 = vsyncpa [#allocation3], 0 }
   0x3   :  { %13 = vsyncpa [#allocation3 + $0x1], 0 }
   0x4   :  { %14 = vsyncpa [#allocation6], 0 }
   0x5   :  { %16 = vsyncpa [#allocation6 + $0x1], 0 }
   0x6   :  { %17 = vsyncpa [#allocation4], 0 }
   0x7   :  { %19 = vsyncpa [#allocation4 + $0x1], 0  ;;  %s735_s21 = smov 0   ;;  %s737_s22 = smov 0  }
   0x8   :  { %s739_s23 = smov 0   ;;  %s741_s24 = smov 0  }
   0x9 LB: > { %921 = sst [smem:[#allocation11_spill]] %s693_s23  ;;  %s756_s25 = sadd.s32 4294967295, %s697_s24   ;;  %s697_s24 = sphi %s741_s24, %s934_s24   ;;  %s693_s23 = sphi %s739_s23, %s931_s23   ;;  %s689_s22 = sphi %s737_s22, %s933_s22   ;;  %s685_s21 = sphi %s735_s21, %s932_s21  }
   0xa   : > { %s489_s26 = sadd.s32 4294967294, %s697_s24   ;;  %s760_s27 = sadd.s32 1, %s697_s24  }
   0xb   : > { %s32_s28 = sadd.s32 1, %s693_s23  ;;  %s29_s29 = ssub.s32 %s697_s24, %s760_s27 }
   0xc   : > { %p39_p0 = scmp.ne.s32.totalorder %s693_s23, %s689_s22  ;;  %p30_p1 = scmp.eq.s32.totalorder %s29_s29, 0 }
   0xd   : > { %p40_p2 = scmp.eq.s32.totalorder %s697_s24, 0  ;;  %p45_p3 = scmp.ne.s32.totalorder %s689_s22, %s685_s21 }
   0xe   : > { %p46_p4 = scmp.eq.s32.totalorder %s756_s25, 0  ;;  %p179_p7 = scmp.eq.s32.totalorder %s756_s25, 3 }
   0xf   : > { %s772_s30 = scalar_select %p30_p1, %s693_s23, %s32_s28  }
  0x10   : > { %p774_p5 = por %p40_p2, %p39_p0  ;;  %p778_p6 = por %p46_p4, %p45_p3 }
  0x11   : > { %922 = sst [smem:[#allocation12_spill]] %s772_s30  ;;  %p185_p8 = scmp.eq.s32.totalorder %s489_s26, 3 }
  0x12   : > { %p526_p9 = scmp.lt.s32.totalorder %s697_s24, 4  ;;  %p784_p10 = por %p179_p7, %p39_p0 }
  0x13   : > { %p788_p11 = por %p185_p8, %p45_p3  ;;  %s793_s11 = sand.u32 1, %s693_s23  }
  0x14   : > { %s507_s12 = sshll.u32 %s697_s24, 4  ;;  %s492_s13 = sshll.u32 %s793_s11, 3 }
  0x15   : > { %s927_s0 = sld [smem:[#allocation13_spill]]  ;;  %s221_s18 = scalar_lea.vmem [#allocation2], %s492_s13 }
  0x16   : > { %s230_s19 = sshll.u32 %s221_s18, 4  ;;  %p802_p12 = pnand %p526_p9, %p774_p5  ;;  %s231_s19 = int_to_ptr.vmem [resolvable:$true] %s230_s19 }
  0x17   : > { %p498_p13 = scmp.ge.s32.totalorder %s697_s24, 1  ;;  %p256_p0 = scmp.lt.s32.totalorder %s697_s24, 5 }
  0x18   : > { %s218_s26 = scalar_lea.sflag [#allocation3], %s793_s11  ;;  %p571_p2 = pneg %p802_p12 }
  0x1b   : > { %s226_s16 = scalar_lea.hbm %s927_s0, %s507_s12  ;;  %s574_s15 = scalar_lea.hbm %s927_s0, 64 }
  0x1c   : > { %s228_s17 = sshll.u32 %s226_s16, 4  ;;  %s229_s17 = int_to_ptr.hbm [resolvable:$true] %s228_s17 }
  0x1d   : > { %s567_s28 = sshra.s32 %s229_s17, 4  ;;  %s568_s28 = int_to_ptr.hbm [resolvable:$true] %s567_s28 }
  0x1e   : > { %s569_s29 = scalar_lea.hbm %s568_s28, 8  ;;  %p575_p5 = scmp.lt.s32.totalorder %s568_s28, %s927_s0 }
  0x1f   : > { %p570_p1 = scmp.ne.s32.totalorder %s568_s28, %s569_s29  ;;  %p576_p7 = scmp.lt.s32.totalorder %s574_s15, %s569_s29 }
  0x21   : > { %p572_p3 = pnand %p571_p2, %p570_p1  ;;  %p577_p8 = por %p576_p7, %p575_p5 }
  0x23   : > { %p573_p4 = pneg %p572_p3 }
  0x25   : > { %p578_p9 = pnand %p577_p8, %p573_p4 }
  0x27   : > { %581 = shalt.err (!%p578_p9)
}
  0x28   : > { %518 = dma.hbm_to_vmem [thread:$0]  (!%p802_p12), %s229_s17, 128, %s231_s19, %s218_s26  }
  0x29   : > { %p826_p1 = pnand %p498_p13, %p256_p0  ;;  %s431_s28 = scalar_lea.hbm %s913_s1, %s507_s12 }
  0x2a   : > { %s432_s29 = scalar_lea.hbm %s431_s28, 8  ;;  %s241_s15 = scalar_lea.vmem [#allocation5], %s492_s13 }
  0x2b   : > { %s251_s18 = sshll.u32 %s241_s15, 4  ;;  %s249_s0 = sshll.u32 %s432_s29, 4  ;;  %s252_s18 = int_to_ptr.vmem [resolvable:$true] %s251_s18  ;;  %s250_s0 = int_to_ptr.hbm [resolvable:$true] %s249_s0 }
  0x2c   : > { %s238_s30 = scalar_lea.sflag [#allocation6], %s793_s11  ;;  %s597_s23 = sshra.s32 %s250_s0, 4  ;;  %s598_s23 = int_to_ptr.hbm [resolvable:$true] %s597_s23 }
  0x2d   : > { %s599_s17 = scalar_lea.hbm %s598_s23, 8  ;;  %s604_s14 = scalar_lea.hbm %s913_s1, 64 }
  0x2e   : > { %p600_p3 = scmp.ne.s32.totalorder %s598_s23, %s599_s17  ;;  %p605_p4 = scmp.lt.s32.totalorder %s598_s23, %s913_s1 }
  0x2f   : > { %p606_p5 = scmp.lt.s32.totalorder %s604_s14, %s599_s17 }
  0x30   : > { %p602_p13 = pnand %p600_p3, %p571_p2 }
  0x31   : > { %p607_p7 = por %p606_p5, %p605_p4 }
  0x32   : > { %p603_p0 = pneg %p602_p13 }
  0x34   : > { %p608_p8 = pnand %p607_p7, %p603_p0 }
  0x36   : > { %611 = shalt.err (!%p608_p8)
}
  0x37   : > { %521 = dma.hbm_to_vmem [thread:$0]  (!%p802_p12), %s250_s0, 128, %s252_s18, %s238_s30  }
  0x38   : > { %260 = sbr.rel (%p826_p1) target bundleno = 353 (0x161), region = 44  ;;  %s848_s11 = sand.u32 (!%p826_p1), 1, %s689_s22  }
  0x39   : > { %s851_s13 = sshll.u32 (!%p826_p1), %s848_s11, 3  ;;  %s263_s23 = scalar_lea.sflag (!%p826_p1), [#allocation3], %s848_s11 }
  0x3a   : > { %s266_s28 = scalar_lea.vmem (!%p826_p1), [#allocation2], %s851_s13 }
  0x3d   : > { %672 = dma.done.wait (%p778_p6), %s263_s23, 128  }
  0x3e   : > { %674 = vsyncadd (%p778_p6), %s263_s23, 4294967168  ;;  %s273_s0 = scalar_lea.sflag [#allocation6], %s848_s11  ;;  %s276_s30 = scalar_lea.vmem [#allocation5], %s851_s13 }
  0x3f   : > { %676 = dma.done.wait (%p778_p6), %s273_s0, 128  }
  0x40   : > { %678 = vsyncadd (%p778_p6), %s273_s0, 4294967168  ;;  %v320_v0 = vld [vmem:[%s276_s30] sm:$0xff]  ;;  %v314_v5 = vld [vmem:[%s917_s5] sm:$0xff]  ;;  %v699_v8 = vmov 0   ;;  %vm351_vm3 = vcmask 64512   ;;  %s504_s26 = sshll.u32 %s756_s25, 3 }
  0x41   : > { %321 = vadd.xlane.f32.xlu0 %v320_v0  ;;  %v324_v1 = vmul.f32 %v320_v0, %v320_v0  ;;  %561 = vset.pattern.permute.xlu1 %v699_v8  ;;  %v563_v16 = vld [vmem:[%s914_s2] ss:$0 sm:$0xff]  ;;  %s389_s16 = scalar_lea.hbm %s918_s6, %s504_s26  ;;  %s310_s23 = scalar_lea.vmem [#allocation7], %s851_s13 }
  0x42   : > { %562 = vset.pattern.permute.xlu0 %v699_v8  ;;  %317 = vperm.xlu1 %561, %v314_v5   ;;  %v564_v21 = vld [vmem:[%s915_s3] ss:$0 sm:$0xff]  ;;  %s391_s0 = sshll.u32 %s310_s23, 4  ;;  %s393_s30 = sshll.u32 %s389_s16, 4  ;;  %s392_s0 = int_to_ptr.vmem [resolvable:$true] %s391_s0  ;;  %s394_s30 = int_to_ptr.hbm [resolvable:$true] %s393_s30 }
  0x43   : > { %v311_v24 = vld [vmem:[%s916_s4] sm:$0xff]  ;;  %s379_s20 = scalar_lea.sflag [#allocation4], %s848_s11  ;;  %s641_s7 = sshra.s32 %s394_s30, 4  ;;  %s642_s7 = int_to_ptr.hbm [resolvable:$true] %s641_s7 }
  0x44   : > { %v375_v27 = vld [vmem:[%s266_s28] sm:$0xff]  ;;  %s643_s25 = scalar_lea.hbm %s642_s7, 8  ;;  %s647_s28 = scalar_lea.hbm %s918_s6, 32 }
  0x45   : > { %p644_p6 = scmp.ne.s32.totalorder %s642_s7, %s643_s25  ;;  %p648_p9 = scmp.lt.s32.totalorder %s642_s7, %s918_s6 }
  0x46   : > { %p649_p1 = scmp.lt.s32.totalorder %s647_s28, %s643_s25 }
  0x47   : > { %p645_p12 = pnand %p644_p6, %p784_p10 }
  0x48   : > { %p650_p3 = por %p649_p1, %p648_p9 }
  0x49   : > { %325 = vadd.xlane.f32.xlu0 %v324_v1  ;;  %p646_p2 = pneg %p645_p12 }
  0x4b   : > { %p651_p13 = pnand %p650_p3, %p646_p2 }
  0xb4   : > { %v322_v2 = vpop.xlane.xlu0 %321  ;;  %v318_v25 = vpop.permute.xlu1 %317 }
  0xb5   : > { %v323_v3 = vmul.f32 0.0078125, %v322_v2 }
  0xb7   : > { %v328_v6 = vmul.f32 %v323_v3, %v323_v3  ;;  %v330_v19 = vsub.f32 %v320_v0, %v323_v3 }
  0xbc   : > { %v326_v4 = vpop.xlane.xlu0 %325 }
  0xbd   : > { %v327_v7 = vmul.f32 0.0078125, %v326_v4 }
  0xbf   : > { %v329_v9 = vsub.f32 %v327_v7, %v328_v6 }
  0xc1   : > { %v331_v10 = vadd.f32 1e-05, %v329_v9 }
  0xc3   : > { %565 = vrsqrt.f32 %v331_v10  ;;  %vm338_vm1 = vweird.f32 %v331_v10 }
  0xc9   : > { %v566_v11 = vpop.eup %565 }
  0xca   : > { %v333_v12 = vmul.f32 %v566_v11, %v331_v10  ;;  %vm339_vm0 = vweird.f32 %v566_v11 }
  0xcb   : > { %vm340_vm2 = vmor %vm338_vm1, %vm339_vm0 }
  0xcc   : > { %v334_v13 = vmul.f32 %v566_v11, %v333_v12 }
  0xce   : > { %v335_v14 = vmul.f32 0.5, %v334_v13 }
  0xd0   : > { %v336_v15 = vsub.f32 1.5, %v335_v14 }
  0xd2   : > { %v337_v17 = vmul.f32 %v566_v11, %v336_v15 }
  0xd4   : > { %v341_v18 = vsel %vm340_vm2, %v566_v11, %v337_v17 }
  0xd5   : > { %v345_v20 = vmul.f32 %v563_v16, %v341_v18 }
  0xd7   : > { %v346_v22 = vmul.f32 %v345_v20, %v330_v19 }
  0xd9   : > { %v350_v23 = vadd.f32 %v564_v21, %v346_v22 }
  0xdb   : > { %370 = vmatpush.msra.mxu0 %v350_v23 }
  0xdc   : > { %502 = vmatmul.msk.f32.vlgmr.msra.gmra.mxu0 %vm351_vm3, %v311_v24 }
 0x159   : > { %v372_v26 = vpop.f32.mrf.mxu0 }
 0x15a   : > { %v373_v28 = vadd.f32 %v372_v26, %v318_v25 }
 0x15c   : > { %v376_v29 = vmul.f32 %v375_v27, %v373_v28 }
 0x15e   : > { %377 = vst [vmem:[%s310_s23] sm:$0xff] %v376_v29 }
 0x15f   : > { %654 = shalt.err (!%p651_p13)
}
 0x160   : > { %513 = dma.vmem_to_hbm [thread:$0]  (%p784_p10), %s392_s0, 128, %s394_s30, %s379_s20  }
 0x161 PF: > { %p527_p0 = scmp.ge.s32.totalorder %s697_s24, 2  ;;  %s405_s11 = sand.u32 1, %s685_s21  }
 0x162   : > { %s406_s18 = scalar_lea.sflag [#allocation4], %s405_s11 }
 0x163   : > { %p523_p4 = pnand %p527_p0, %p788_p11 }
 0x165   : > { %p524_p5 = pneg %p523_p4 }
 0x167   : > { %680 = dma.done.wait (%p524_p5), %s406_s18, 128  }
 0x168   : > { %682 = vsyncadd (%p524_p5), %s406_s18, 4294967168  ;;  %s930_s17 = sld [smem:[#allocation11_spill]]  ;;  %p22_p7 = scmp.ge.s32.totalorder %s760_s27, 6  }
 0x169   : > { %s931_s23 = sld [smem:[#allocation12_spill]]  ;;  %s932_s21 = smov %s689_s22 }
 0x16a   : > { %s934_s24 = smov %s760_s27  ;;  %24 = sbr.rel (!%p22_p7) target bundleno = 9 (0x9), region = 102 }
 0x16e   : > { %s933_s22 = smov %s930_s17 }
 0x16f   :  { %412 = vsyncpa [#allocation3], 1 }
 0x170   :  { %414 = vsyncpa [#allocation3 + $0x1], 1 }
 0x171   :  { %415 = vsyncpa [#allocation6], 1 }
 0x172   :  { %417 = vsyncpa [#allocation6 + $0x1], 1 }
 0x173   :  { %418 = vsyncpa [#allocation4], 1 }
 0x174   :  { %420 = vsyncpa [#allocation4 + $0x1], 1 }

</bundles_post_ra>
